<compile_context>
chip_gen: v7x
topology: tpu7x:2x2x1
jax: 0.10.0
libtpu: 0.0.40
codegen_flags: <defaults>
</compile_context>

<pallas_src>
import functools
import math

import jax
import jax.numpy as jnp
from jax.experimental import pallas as pl
from jax.experimental.pallas import tpu as pltpu


# ------------------------------ Fused kernel -------------------------------- #

def _fused_mhsa_kernel(
    x_ref,       # (Bb, S, E)   activations block (Bb = B or 1)
    wqkv_ref,    # (E, 3*H*D)   flat QKV weights (Q columns pre-scaled by 1/sqrt(D))
    bqkv_ref,    # (1, 3*H*D)   lane-dense QKV bias (Q part pre-scaled)
    wo_ref,      # (H*D, E)     flat output projection weights
    bo_ref,      # (1, E)       output projection bias
    o_ref,       # (Bb, S, E)   output block
    *,
    nhead,
    head_dim,
    mxu_dtype,
    approx_recip,
):
    H, D = nhead, head_dim
    HD = H * D
    Bb, S, E = x_ref.shape
    R = Bb * S

    # ---- QKV: one flat lane-dense matmul over all rows and all heads ---------
    xf = x_ref[...].reshape(R, E).astype(mxu_dtype)            # leading collapse
    w_qkv = wqkv_ref[...].astype(mxu_dtype)                    # (E, 3HD)
    qkv = jnp.dot(xf, w_qkv, preferred_element_type=jnp.float32) + bqkv_ref[...]
    # qkv: (R, 3HD) f32; scale 1/sqrt(D) already folded into the Q columns.

    # ---- split into per-(batch, head) tensors with static lane slices --------
    def split_heads(base):
        parts = [
            qkv[:, base + h * D: base + (h + 1) * D].reshape(Bb, 1, S, D)
            for h in range(H)
        ]
        return jnp.concatenate(parts, axis=1).reshape(Bb * H, S, D)

    q = split_heads(0).astype(mxu_dtype)        # (Bb*H, S, D)
    k = split_heads(HD).astype(mxu_dtype)       # (Bb*H, S, D)
    v = split_heads(2 * HD).astype(mxu_dtype)   # (Bb*H, S, D)

    # ---- attention scores, batched over (batch, head) ------------------------
    scores = jnp.einsum(
        "nqd,nkd->nqk", q, k, preferred_element_type=jnp.float32
    )                                                           # (Bb*H, S, S)

    # causal mask from iota; large finite negative (safer than -inf if a fully
    # masked row ever appears) -> exp underflows to exactly 0, matching the ref.
    row = jax.lax.broadcasted_iota(jnp.int32, (S, S), 0)
    col = jax.lax.broadcasted_iota(jnp.int32, (S, S), 1)
    scores = jnp.where((col <= row)[None], scores, -1e30)

    # ---- softmax in f32 (exp(x - max) / sum) ----------------------------------
    m = jnp.max(scores, axis=-1, keepdims=True)
    z = jnp.exp(scores - m)
    denom = jnp.sum(z, axis=-1, keepdims=True)
    # TODO(synk): ghost parameter path (z_sum += ghost per head) not wired in;
    #             module default is ghost=False -> ghost=None.
    p = z * pl.reciprocal(denom, approx=approx_recip)           # (Bb*H, S, S)

    # ---- A = P @ V, batched over (batch, head) --------------------------------
    a = jnp.einsum(
        "nqk,nkd->nqd", p.astype(mxu_dtype), v,
        preferred_element_type=jnp.float32,
    )                                                           # (Bb*H, S, D)

    # ---- output projection with the head reduction fused into the MXU --------
    a4 = a.reshape(Bb, H, S, D)
    a_cat = jnp.concatenate([a4[:, h] for h in range(H)], axis=-1)  # (Bb, S, HD)
    a_flat = a_cat.reshape(R, HD).astype(mxu_dtype)
    out = jnp.dot(
        a_flat, wo_ref[...].astype(mxu_dtype),
        preferred_element_type=jnp.float32,
    ) + bo_ref[...]                                             # (R, E)

    o_ref[...] = out.reshape(Bb, S, E).astype(o_ref.dtype)


# --------------------------------- Wrapper ---------------------------------- #

def _tensorcores_per_chip() -> int:
    """2 on v7x-class chips (2 TCs/chip), else 1. Defensive: defaults to 1."""
    try:
        kind = jax.devices()[0].device_kind.lower()
    except Exception:
        return 1
    return 2 if ("v7" in kind or "7x" in kind) else 1


def fused_mhsa(x, wqkv, bqkv, wo, bo, *, nhead, head_dim,
               mxu_dtype=jnp.bfloat16, approx_recip=True, batch_grid=None):
    """x: (B, S, E) -> (B, S, E). One grid step total on 1-TC chips; one per
    batch element (parallel) on 2-TC chips when B >= 2."""
    B, S, E = x.shape
    HD = nhead * head_dim
    THD = 3 * HD

    if batch_grid is None:
        batch_grid = (B >= 2) and (_tensorcores_per_chip() >= 2)

    kernel = functools.partial(
        _fused_mhsa_kernel, nhead=nhead, head_dim=head_dim,
        mxu_dtype=mxu_dtype, approx_recip=approx_recip,
    )

    flops = (2 * B * S * E * THD                   # QKV projection
             + 2 * B * nhead * S * S * head_dim    # Q @ K^T
             + 2 * B * nhead * S * S * head_dim    # P @ V
             + 2 * B * S * HD * E)                 # output projection
    bytes_accessed = 4 * (x.size + wqkv.size + bqkv.size + wo.size + bo.size
                          + B * S * E)
    cost = pl.CostEstimate(
        flops=flops,
        transcendentals=B * nhead * S * S,
        bytes_accessed=bytes_accessed,
    )

    if batch_grid:
        grid, xb, sem = (B,), 1, ("parallel",)     # one batch element per TC
    else:
        grid, xb, sem = (1,), B, ("arbitrary",)    # whole batch in one step

    # TODO(synk): at production sizes keep the constant weights resident
    # (single-buffered / one-time DMA) and budget tiles against 64 MiB on v7x.
    return pl.pallas_call(
        kernel,
        out_shape=jax.ShapeDtypeStruct((B, S, E), x.dtype),
        grid=grid,
        in_specs=[
            pl.BlockSpec((xb, S, E), lambda i: (i, 0, 0)),
            pl.BlockSpec((E, THD), lambda i: (0, 0)),
            pl.BlockSpec((1, THD), lambda i: (0, 0)),
            pl.BlockSpec((HD, E), lambda i: (0, 0)),
            pl.BlockSpec((1, E), lambda i: (0, 0)),
        ],
        out_specs=pl.BlockSpec((xb, S, E), lambda i: (i, 0, 0)),
        compiler_params=pltpu.CompilerParams(dimension_semantics=sem),
        cost_estimate=cost,
    )(x, wqkv, bqkv, wo, bo)


# --------------------------- Module (glue in JAX) --------------------------- #

def _xavier_uniform(key, fan_in, fan_out, shape):
    limit = math.sqrt(6.0 / (fan_in + fan_out))
    return jax.random.uniform(key, shape, jnp.float32, -limit, limit)


class MultiHeadSelfAttentionPallas:
    """Mirrors the PyTorch MultiHeadSelfAttention forward (causal=True, ghost=None)."""

    def __init__(self, embed_dim=32, nhead=4, head_dim=8, key=jax.random.PRNGKey(0)):
        self.embed_dim = embed_dim
        self.nhead = nhead
        self.head_dim = head_dim
        E, H, D = embed_dim, nhead, head_dim
        k1, k2 = jax.random.split(key)

        # Parameters stored (in, out) so y = x @ W, matching the reference math.
        self.wqkv_w = _xavier_uniform(k1, E, 3 * H * D, (E, 3 * H * D))
        self.wqkv_b = jnp.zeros((3 * H * D,), jnp.float32)
        self.wo_w = _xavier_uniform(k2, H * D, E, (H * D, E))
        self.wo_b = jnp.zeros((E,), jnp.float32)

        # One-time layout plumbing for the kernel (outside the kernel):
        #   * fold 1/sqrt(D) into the Q columns of Wqkv and bqkv,
        #   * lane-dense bias rows.
        scale_cols = jnp.concatenate([
            jnp.full((H * D,), 1.0 / math.sqrt(D), jnp.float32),
            jnp.ones((2 * H * D,), jnp.float32),
        ])
        self.wqkv_k = self.wqkv_w * scale_cols[None, :]     # (E, 3HD)
        self.bqkv_k = (self.wqkv_b * scale_cols)[None, :]   # (1, 3HD)
        self.wo_k = self.wo_w                               # (HD, E)
        self.bo_k = self.wo_b[None, :]                      # (1, E)

    def __call__(self, x, *, mxu_dtype=jnp.bfloat16, approx_recip=True,
                 batch_grid=None):
        return fused_mhsa(
            x, self.wqkv_k, self.bqkv_k, self.wo_k, self.bo_k,
            nhead=self.nhead, head_dim=self.head_dim,
            mxu_dtype=mxu_dtype, approx_recip=approx_recip,
            batch_grid=batch_grid,
        )


# ------------------------------ Reference (JAX) ----------------------------- #

def reference_forward(module, x):
    B, S, E = x.shape
    H, D = module.nhead, module.head_dim
    qkv = x.reshape(B * S, E) @ module.wqkv_w + module.wqkv_b
    qkv = jnp.transpose(qkv.reshape(B, S, 3, H, D), (0, 3, 2, 1, 4))
    q, k, v = qkv[:, :, 0], qkv[:, :, 1], qkv[:, :, 2]
    scores = jnp.einsum("bhqe,bhke->bhqk", q, k) / math.sqrt(D)
    mask = jnp.where(
        jnp.arange(S)[:, None] >= jnp.arange(S)[None, :], 0.0, -jnp.inf
    )
    scores = scores + mask[None, None]
    m = jnp.max(scores, axis=-1, keepdims=True)
    z = jnp.exp(scores - m)
    p = z / jnp.sum(z, axis=-1, keepdims=True)
    a = jnp.einsum("bhqk,bhke->bhqe", p, v)
    a = a.transpose(0, 2, 1, 3).reshape(B, S, H * D)
    return (a.reshape(B * S, H * D) @ module.wo_w + module.wo_b).reshape(B, S, E)


# ----------------------------------- Main ----------------------------------- #

if __name__ == "__main__":
    key = jax.random.PRNGKey(0)
    k_param, k_input = jax.random.split(key)

    batch, seq, embed_dim, nhead, head_dim = 2, 8, 32, 4, 8
    module = MultiHeadSelfAttentionPallas(
        embed_dim=embed_dim, nhead=nhead, head_dim=head_dim, key=k_param
    )
    x = jax.random.normal(k_input, (batch, seq, embed_dim), jnp.float32)

    ref = reference_forward(module, x)

    # 1) exact configuration (f32 MXU inputs, exact reciprocal), single-step grid.
    out_single = jax.block_until_ready(
        module(x, mxu_dtype=jnp.float32, approx_recip=False, batch_grid=False)
    )
    assert out_single.shape == (batch, seq, embed_dim)
    assert jnp.allclose(out_single, ref, atol=2e-5, rtol=2e-5), "f32 single-step mismatch"

    # 2) exact configuration, batch-gridded path (the v7x 2-TC split) — also
    #    exercised here so both code paths are compile-verified on any chip.
    out_bgrid = jax.block_until_ready(
        module(x, mxu_dtype=jnp.float32, approx_recip=False, batch_grid=True)
    )
    assert jnp.allclose(out_bgrid, ref, atol=2e-5, rtol=2e-5), "f32 batch-grid mismatch"

    # 3) performance configuration (bf16 MXU inputs + EUP approx reciprocal,
    #    f32 accumulate/softmax), auto grid selection; loose tolerance for bf16.
    out_fast = jax.block_until_ready(
        module(x, mxu_dtype=jnp.bfloat16, approx_recip=True)
    )
    assert out_fast.shape == (batch, seq, embed_dim)
    assert jnp.allclose(out_fast, ref, atol=1e-1, rtol=1e-1), "bf16 path mismatch"

    print("KERNEL_OK")
</pallas_src>

<mosaic_0001>
module attributes {stable_mosaic.version = 11 : i64} {
  func.func @_fused_mhsa_kernel(%arg0: i32, %arg1: memref<2x8x32xf32, #tpu.memory_space<vmem>>, %arg2: memref<32x96xf32, #tpu.memory_space<vmem>>, %arg3: memref<1x96xf32, #tpu.memory_space<vmem>>, %arg4: memref<32x32xf32, #tpu.memory_space<vmem>>, %arg5: memref<1x32xf32, #tpu.memory_space<vmem>>, %arg6: memref<2x8x32xf32, #tpu.memory_space<vmem>>) attributes {dimension_semantics = [#tpu.dimension_semantics<arbitrary>], iteration_bounds = array<i64: 1>, scalar_prefetch = 0 : i64, scratch_operands = 0 : i64, tpu.core_type = #tpu.core_type<tc>, window_params = [{transform_indices = @transform_0, window_bounds = array<i64: 2, 8, 32>}, {pipeline_mode = #tpu.pipeline_mode<synchronous>, transform_indices = @transform_1, window_bounds = array<i64: 32, 96>}, {pipeline_mode = #tpu.pipeline_mode<synchronous>, transform_indices = @transform_2, window_bounds = array<i64: 1, 96>}, {pipeline_mode = #tpu.pipeline_mode<synchronous>, transform_indices = @transform_3, window_bounds = array<i64: 32, 32>}, {pipeline_mode = #tpu.pipeline_mode<synchronous>, transform_indices = @transform_4, window_bounds = array<i64: 1, 32>}, {transform_indices = @transform_5, window_bounds = array<i64: 2, 8, 32>}]} {
    %c0 = arith.constant 0 : index
    %c0_0 = arith.constant 0 : index
    %c0_1 = arith.constant 0 : index
    %0 = vector.load %arg1[%c0, %c0_0, %c0_1] : memref<2x8x32xf32, #tpu.memory_space<vmem>>, vector<2x8x32xf32>
    %1 = vector.shape_cast %0 : vector<2x8x32xf32> to vector<16x32xf32>
    %c0_2 = arith.constant 0 : index
    %c0_3 = arith.constant 0 : index
    %2 = vector.load %arg2[%c0_2, %c0_3] : memref<32x96xf32, #tpu.memory_space<vmem>>, vector<32x96xf32>
    %cst = arith.constant dense<0.000000e+00> : vector<16x96xf32>
    %3 = tpu.matmul %1, %2, %cst {dimension_numbers = #tpu.dot_dimension_numbers<[1], [0], [0], [1], [0, 0, 1, 1], [], []>} : vector<16x32xf32>, vector<32x96xf32>, vector<16x96xf32> -> vector<16x96xf32>
    %c0_4 = arith.constant 0 : index
    %c0_5 = arith.constant 0 : index
    %4 = vector.load %arg3[%c0_4, %c0_5] : memref<1x96xf32, #tpu.memory_space<vmem>>, vector<1x96xf32>
    %5 = vector.broadcast %4 : vector<1x96xf32> to vector<16x96xf32>
    %6 = arith.addf %3, %5 : vector<16x96xf32>
    %7 = vector.extract_strided_slice %6 {offsets = [0, 0], sizes = [16, 8], strides = [1, 1]} : vector<16x96xf32> to vector<16x8xf32>
    %8 = vector.shape_cast %7 : vector<16x8xf32> to vector<2x1x8x8xf32>
    %9 = vector.extract_strided_slice %6 {offsets = [0, 8], sizes = [16, 8], strides = [1, 1]} : vector<16x96xf32> to vector<16x8xf32>
    %10 = vector.shape_cast %9 : vector<16x8xf32> to vector<2x1x8x8xf32>
    %11 = vector.extract_strided_slice %6 {offsets = [0, 16], sizes = [16, 8], strides = [1, 1]} : vector<16x96xf32> to vector<16x8xf32>
    %12 = vector.shape_cast %11 : vector<16x8xf32> to vector<2x1x8x8xf32>
    %13 = vector.extract_strided_slice %6 {offsets = [0, 24], sizes = [16, 8], strides = [1, 1]} : vector<16x96xf32> to vector<16x8xf32>
    %14 = vector.shape_cast %13 : vector<16x8xf32> to vector<2x1x8x8xf32>
    %15 = tpu.concatenate %8, %10, %12, %14 in 1 : vector<2x1x8x8xf32>, vector<2x1x8x8xf32>, vector<2x1x8x8xf32>, vector<2x1x8x8xf32> -> vector<2x4x8x8xf32>
    %16 = vector.shape_cast %15 : vector<2x4x8x8xf32> to vector<8x8x8xf32>
    %17 = vector.extract_strided_slice %6 {offsets = [0, 32], sizes = [16, 8], strides = [1, 1]} : vector<16x96xf32> to vector<16x8xf32>
    %18 = vector.shape_cast %17 : vector<16x8xf32> to vector<2x1x8x8xf32>
    %19 = vector.extract_strided_slice %6 {offsets = [0, 40], sizes = [16, 8], strides = [1, 1]} : vector<16x96xf32> to vector<16x8xf32>
    %20 = vector.shape_cast %19 : vector<16x8xf32> to vector<2x1x8x8xf32>
    %21 = vector.extract_strided_slice %6 {offsets = [0, 48], sizes = [16, 8], strides = [1, 1]} : vector<16x96xf32> to vector<16x8xf32>
    %22 = vector.shape_cast %21 : vector<16x8xf32> to vector<2x1x8x8xf32>
    %23 = vector.extract_strided_slice %6 {offsets = [0, 56], sizes = [16, 8], strides = [1, 1]} : vector<16x96xf32> to vector<16x8xf32>
    %24 = vector.shape_cast %23 : vector<16x8xf32> to vector<2x1x8x8xf32>
    %25 = tpu.concatenate %18, %20, %22, %24 in 1 : vector<2x1x8x8xf32>, vector<2x1x8x8xf32>, vector<2x1x8x8xf32>, vector<2x1x8x8xf32> -> vector<2x4x8x8xf32>
    %26 = vector.shape_cast %25 : vector<2x4x8x8xf32> to vector<8x8x8xf32>
    %27 = vector.extract_strided_slice %6 {offsets = [0, 64], sizes = [16, 8], strides = [1, 1]} : vector<16x96xf32> to vector<16x8xf32>
    %28 = vector.shape_cast %27 : vector<16x8xf32> to vector<2x1x8x8xf32>
    %29 = vector.extract_strided_slice %6 {offsets = [0, 72], sizes = [16, 8], strides = [1, 1]} : vector<16x96xf32> to vector<16x8xf32>
    %30 = vector.shape_cast %29 : vector<16x8xf32> to vector<2x1x8x8xf32>
    %31 = vector.extract_strided_slice %6 {offsets = [0, 80], sizes = [16, 8], strides = [1, 1]} : vector<16x96xf32> to vector<16x8xf32>
    %32 = vector.shape_cast %31 : vector<16x8xf32> to vector<2x1x8x8xf32>
    %33 = vector.extract_strided_slice %6 {offsets = [0, 88], sizes = [16, 8], strides = [1, 1]} : vector<16x96xf32> to vector<16x8xf32>
    %34 = vector.shape_cast %33 : vector<16x8xf32> to vector<2x1x8x8xf32>
    %35 = tpu.concatenate %28, %30, %32, %34 in 1 : vector<2x1x8x8xf32>, vector<2x1x8x8xf32>, vector<2x1x8x8xf32>, vector<2x1x8x8xf32> -> vector<2x4x8x8xf32>
    %36 = vector.shape_cast %35 : vector<2x4x8x8xf32> to vector<8x8x8xf32>
    "tpu.trace_start"() <{level = 10 : i32, message = "nqd,nkd->nqk"}> : () -> ()
    %cst_6 = arith.constant dense<0.000000e+00> : vector<8x8x8xf32>
    %37 = tpu.matmul %16, %26, %cst_6 {dimension_numbers = #tpu.dot_dimension_numbers<[2], [2], [1], [1], [0, 0, 0, 1, 1, 1], [0], [0]>} : vector<8x8x8xf32>, vector<8x8x8xf32>, vector<8x8x8xf32> -> vector<8x8x8xf32>
    "tpu.trace_stop"() : () -> ()
    %38 = tpu.iota {dimensions = array<i32: 0>} : vector<8x8xi32>
    %39 = tpu.iota {dimensions = array<i32: 1>} : vector<8x8xi32>
    %40 = arith.cmpi sle, %39, %38 : vector<8x8xi32>
    %41 = vector.shape_cast %40 : vector<8x8xi1> to vector<1x8x8xi1>
    %cst_7 = arith.constant -1.000000e+30 : f32
    %42 = vector.shape_cast %41 : vector<1x8x8xi1> to vector<1x8x8xi1>
    %43 = vector.broadcast %42 : vector<1x8x8xi1> to vector<8x8x8xi1>
    %44 = vector.broadcast %cst_7 : f32 to vector<8x8x8xf32>
    %45 = arith.select %43, %37, %44 : vector<8x8x8xi1>, vector<8x8x8xf32>
    %cst_8 = arith.constant dense<0xFF800000> : vector<8x8xf32>
    %46 = vector.multi_reduction <maximumf>, %45, %cst_8 [2] : vector<8x8x8xf32> to vector<8x8xf32>
    %47 = vector.shape_cast %46 : vector<8x8xf32> to vector<8x8x1xf32>
    %48 = vector.broadcast %47 : vector<8x8x1xf32> to vector<8x8x8xf32>
    %49 = arith.subf %45, %48 : vector<8x8x8xf32>
    %50 = math.exp %49 : vector<8x8x8xf32>
    %cst_9 = arith.constant dense<0.000000e+00> : vector<8x8xf32>
    %51 = vector.multi_reduction <add>, %50, %cst_9 [2] : vector<8x8x8xf32> to vector<8x8xf32>
    %52 = vector.shape_cast %51 : vector<8x8xf32> to vector<8x8x1xf32>
    %53 = tpu.reciprocal %52 : vector<8x8x1xf32> -> vector<8x8x1xf32>
    %54 = vector.broadcast %53 : vector<8x8x1xf32> to vector<8x8x8xf32>
    %55 = arith.mulf %50, %54 : vector<8x8x8xf32>
    "tpu.trace_start"() <{level = 10 : i32, message = "nqk,nkd->nqd"}> : () -> ()
    %cst_10 = arith.constant dense<0.000000e+00> : vector<8x8x8xf32>
    %56 = tpu.matmul %55, %36, %cst_10 {dimension_numbers = #tpu.dot_dimension_numbers<[2], [1], [1], [2], [0, 0, 0, 1, 1, 2], [0], [0]>} : vector<8x8x8xf32>, vector<8x8x8xf32>, vector<8x8x8xf32> -> vector<8x8x8xf32>
    "tpu.trace_stop"() : () -> ()
    %57 = vector.shape_cast %56 : vector<8x8x8xf32> to vector<2x4x8x8xf32>
    %58 = vector.extract_strided_slice %57 {offsets = [0, 0, 0, 0], sizes = [2, 1, 8, 8], strides = [1, 1, 1, 1]} : vector<2x4x8x8xf32> to vector<2x1x8x8xf32>
    %59 = vector.shape_cast %58 : vector<2x1x8x8xf32> to vector<2x8x8xf32>
    %60 = vector.extract_strided_slice %57 {offsets = [0, 1, 0, 0], sizes = [2, 1, 8, 8], strides = [1, 1, 1, 1]} : vector<2x4x8x8xf32> to vector<2x1x8x8xf32>
    %61 = vector.shape_cast %60 : vector<2x1x8x8xf32> to vector<2x8x8xf32>
    %62 = vector.extract_strided_slice %57 {offsets = [0, 2, 0, 0], sizes = [2, 1, 8, 8], strides = [1, 1, 1, 1]} : vector<2x4x8x8xf32> to vector<2x1x8x8xf32>
    %63 = vector.shape_cast %62 : vector<2x1x8x8xf32> to vector<2x8x8xf32>
    %64 = vector.extract_strided_slice %57 {offsets = [0, 3, 0, 0], sizes = [2, 1, 8, 8], strides = [1, 1, 1, 1]} : vector<2x4x8x8xf32> to vector<2x1x8x8xf32>
    %65 = vector.shape_cast %64 : vector<2x1x8x8xf32> to vector<2x8x8xf32>
    %66 = tpu.concatenate %59, %61, %63, %65 in 2 : vector<2x8x8xf32>, vector<2x8x8xf32>, vector<2x8x8xf32>, vector<2x8x8xf32> -> vector<2x8x32xf32>
    %67 = vector.shape_cast %66 : vector<2x8x32xf32> to vector<16x32xf32>
    %c0_11 = arith.constant 0 : index
    %c0_12 = arith.constant 0 : index
    %68 = vector.load %arg4[%c0_11, %c0_12] : memref<32x32xf32, #tpu.memory_space<vmem>>, vector<32x32xf32>
    %cst_13 = arith.constant dense<0.000000e+00> : vector<16x32xf32>
    %69 = tpu.matmul %67, %68, %cst_13 {dimension_numbers = #tpu.dot_dimension_numbers<[1], [0], [0], [1], [0, 0, 1, 1], [], []>} : vector<16x32xf32>, vector<32x32xf32>, vector<16x32xf32> -> vector<16x32xf32>
    %c0_14 = arith.constant 0 : index
    %c0_15 = arith.constant 0 : index
    %70 = vector.load %arg5[%c0_14, %c0_15] : memref<1x32xf32, #tpu.memory_space<vmem>>, vector<1x32xf32>
    %71 = vector.broadcast %70 : vector<1x32xf32> to vector<16x32xf32>
    %72 = arith.addf %69, %71 : vector<16x32xf32>
    %73 = vector.shape_cast %72 : vector<16x32xf32> to vector<2x8x32xf32>
    %c0_16 = arith.constant 0 : index
    %c0_17 = arith.constant 0 : index
    %c0_18 = arith.constant 0 : index
    %74 = vector.load %arg6[%c0_16, %c0_17, %c0_18] : memref<2x8x32xf32, #tpu.memory_space<vmem>>, vector<2x8x32xf32>
    tpu.vector_store %arg6[%c0_16, %c0_17, %c0_18], %73 {strides = array<i32>} : memref<2x8x32xf32, #tpu.memory_space<vmem>>, vector<2x8x32xf32>,
    return
  }
  func.func @transform_0(%arg0: i32) -> (i32, i32, i32) {
    %c0_i32 = arith.constant 0 : i32
    %c0_i32_0 = arith.constant 0 : i32
    %c0_i32_1 = arith.constant 0 : i32
    return %arg0, %c0_i32, %c0_i32_0 : i32, i32, i32
  }
  func.func @transform_1(%arg0: i32) -> (i32, i32) {
    %c0_i32 = arith.constant 0 : i32
    %c0_i32_0 = arith.constant 0 : i32
    %c0_i32_1 = arith.constant 0 : i32
    return %c0_i32, %c0_i32_0 : i32, i32
  }
  func.func @transform_2(%arg0: i32) -> (i32, i32) {
    %c0_i32 = arith.constant 0 : i32
    %c0_i32_0 = arith.constant 0 : i32
    %c0_i32_1 = arith.constant 0 : i32
    return %c0_i32, %c0_i32_0 : i32, i32
  }
  func.func @transform_3(%arg0: i32) -> (i32, i32) {
    %c0_i32 = arith.constant 0 : i32
    %c0_i32_0 = arith.constant 0 : i32
    %c0_i32_1 = arith.constant 0 : i32
    return %c0_i32, %c0_i32_0 : i32, i32
  }
  func.func @transform_4(%arg0: i32) -> (i32, i32) {
    %c0_i32 = arith.constant 0 : i32
    %c0_i32_0 = arith.constant 0 : i32
    %c0_i32_1 = arith.constant 0 : i32
    return %c0_i32, %c0_i32_0 : i32, i32
  }
  func.func @transform_5(%arg0: i32) -> (i32, i32, i32) {
    %c0_i32 = arith.constant 0 : i32
    %c0_i32_0 = arith.constant 0 : i32
    %c0_i32_1 = arith.constant 0 : i32
    return %arg0, %c0_i32, %c0_i32_0 : i32, i32, i32
  }
}

</mosaic_0001>

<bundles_post_ra>
// kernel: tpu_custom_call.1
= control target key start
LH: loop header
LB: loop body
LE: loop exit
PB: predicated region body
PF: predicated region fallthrough
CT: control target
= control target key end

     0   :  { %10 = vsyncpa [#allocation3], 0  ;;  %s2270_s0 = inlined_call_operand.hbm [shape: f32[2,8,32], index: 0, kind: input, shape index: {}]   ;;  %s2271_s1 = inlined_call_operand.hbm [shape: f32[32,96], index: 1, kind: input, shape index: {}]   ;;  %s2272_s2 = inlined_call_operand.vmem [shape: f32[1,96], index: 2, kind: input, shape index: {}]   ;;  %s2273_s3 = inlined_call_operand.hbm [shape: f32[32,32], index: 3, kind: input, shape index: {}]   ;;  %s2274_s4 = inlined_call_operand.vmem [shape: f32[1,32], index: 4, kind: input, shape index: {}]   ;;  %s2275_s5 = inlined_call_operand.hbm [shape: f32[2,8,32], index: 5, kind: output, shape index: {}]  }
   0x1   :  { %11 = vsyncpa [#allocation6], 0 }
   0x2   :  { %12 = vsyncpa [#allocation4], 0  ;;  %s1968_s18 = smov [#allocation5]   ;;  %s1969_s20 = smov [#allocation2]  }
   0x3   :  { %s30_s19 = sshll.u32 %s1968_s18, 4  ;;  %s18_s21 = sshll.u32 %s1969_s20, 4  ;;  %s31_s19 = int_to_ptr.vmem [resolvable:$true] %s30_s19  ;;  %s2013_s21 = int_to_ptr.vmem [resolvable:$true] %s18_s21 }
   0x4   :  { %s1874_s24 = scalar_lea.hbm %s2271_s1, 512 }
   0x5   :  { %p1875_p0 = scmp.ne.s32.totalorder %s2271_s1, %s1874_s24  ;;  %p1878_p1 = scmp.lt.u32.totalorder %s1874_s24, %s2271_s1 }
   0x7   :  { %p1880_p2 = pnand %p1878_p1, %p1875_p0 }
   0x9   :  { %1883 = shalt.err (!%p1880_p2)
}
   0xa   :  { %s1884_s29 = scalar_lea.vmem %s31_s19, 512  ;;  %p1889_p4 = scmp.lt.s32.totalorder %s31_s19, %s31_s19 }
   0xb   :  { %p1885_p3 = scmp.ne.s32.totalorder %s31_s19, %s1884_s29  ;;  %p1890_p5 = scmp.lt.s32.totalorder %s1884_s29, %s1884_s29 }
   0xd   :  { %p1891_p6 = por %p1890_p5, %p1889_p4 }
   0xf   :  { %p1892_p7 = pnand %p1891_p6, %p1885_p3 }
  0x11   :  { %1895 = shalt.err (!%p1892_p7)
}
  0x12   :  { %s1970_s30 = smov 128   ;;  %s1971_s6 = smov 8  }
  0x13   :  { %36 = dma.hbm_to_vmem [thread:$0]  %s2271_s1, 512, %s31_s19, [#allocation6], %s1970_s30, %s1970_s30, %s1971_s6  }
  0x14   :  { %s1896_s11 = scalar_lea.hbm %s2270_s0, 256 }
  0x15   :  { %p1897_p8 = scmp.ne.s32.totalorder %s2270_s0, %s1896_s11  ;;  %p1900_p9 = scmp.lt.u32.totalorder %s1896_s11, %s2270_s0 }
  0x17   :  { %p1902_p10 = pnand %p1900_p9, %p1897_p8 }
  0x19   :  { %1905 = shalt.err (!%p1902_p10)
}
  0x1a   :  { %s1906_s16 = scalar_lea.vmem %s2013_s21, 256  ;;  %p1911_p12 = scmp.lt.s32.totalorder %s2013_s21, %s2013_s21 }
  0x1b   :  { %p1907_p11 = scmp.ne.s32.totalorder %s2013_s21, %s1906_s16  ;;  %p1912_p13 = scmp.lt.s32.totalorder %s1906_s16, %s1906_s16 }
  0x1d   :  { %p1913_p0 = por %p1912_p13, %p1911_p12 }
  0x1f   :  { %p1914_p1 = pnand %p1913_p0, %p1907_p11 }
  0x21   :  { %1917 = shalt.err (!%p1914_p1)
}
  0x22   :  { %24 = dma.hbm_to_vmem [thread:$0]  %s2270_s0, 256, %s2013_s21, [#allocation3], %s1970_s30, %s1970_s30, %s1971_s6  }
  0x23   :  { %s1972_s18 = smov [#allocation7]   ;;  %s1918_s23 = scalar_lea.hbm %s2273_s3, 512 }
  0x24   :  { %s44_s19 = sshll.u32 %s1972_s18, 4  ;;  %p1919_p2 = scmp.ne.s32.totalorder %s2273_s3, %s1918_s23  ;;  %s45_s19 = int_to_ptr.vmem [resolvable:$true] %s44_s19 }
  0x25   :  { %p1922_p3 = scmp.lt.u32.totalorder %s1918_s23, %s2273_s3 }
  0x27   :  { %p1924_p4 = pnand %p1922_p3, %p1919_p2 }
  0x29   :  { %1927 = shalt.err (!%p1924_p4)
}
  0x2a   :  { %s1928_s28 = scalar_lea.vmem %s45_s19, 512  ;;  %p1933_p6 = scmp.lt.s32.totalorder %s45_s19, %s45_s19 }
  0x2b   :  { %p1929_p5 = scmp.ne.s32.totalorder %s45_s19, %s1928_s28  ;;  %p1934_p7 = scmp.lt.s32.totalorder %s1928_s28, %s1928_s28 }
  0x2d   :  { %p1935_p8 = por %p1934_p7, %p1933_p6 }
  0x2f   :  { %p1936_p9 = pnand %p1935_p8, %p1929_p5 }
  0x31   :  { %1939 = shalt.err (!%p1936_p9)
}
  0x32   :  { %50 = dma.hbm_to_vmem [thread:$0]  %s2273_s3, 512, %s45_s19, [#allocation6], %s1970_s30, %s1970_s30, %s1971_s6  }
  0x33   :  { %1962 = dma.done.wait [#allocation3], 256  }
  0x34   :  { %1963 = vsyncadd [#allocation3], 4294967040 }
  0x35   :  { %1964 = dma.done.wait [#allocation6], 1024  }
  0x36   :  { %1965 = vsyncadd [#allocation6], 4294966272  ;;  %vm75_vm0 = vcmask 261120   ;;  %v64_v0 = vld [vmem:[#allocation5] sm:$0xff]  ;;  %v65_v1 = vld [vmem:[#allocation5 + $0x8] sm:$0xff]  ;;  %v1973_v10 = vmov 0.0   ;;  %v780_v28 = vlaneseq }
  0x37   :  { %v66_v2 = vld [vmem:[#allocation5 + $0x10] sm:$0xff]  ;;  %v1811_v3 = vpack.c.bf16 %v65_v1, %v64_v0  ;;  %v67_v4 = vld [vmem:[#allocation5 + $0x18] sm:$0xff]  ;;  %1720 = vmatprep.subr.mxu1 %v1973_v10  ;;  %s1974_s7 = smov 104   ;;  %s1975_s8 = smov 120   ;;  %vm1976_vm1 = vmmov 0   ;;  %vm173_vm2 = vcmask 64512  }
  0x38   :  { %v62_v5 = vld [vmem:[#allocation2] sm:$0xff]  ;;  %v1815_v6 = vpack.c.bf16 %v67_v4, %v66_v2  ;;  %v63_v7 = vld [vmem:[#allocation2 + $0x8] sm:$0xff]  ;;  %1722 = vmatprep.mubr.msk.f32.mxu1 %vm1976_vm1, %v1973_v10  ;;  %s1978_s9 = smov 96   ;;  %v781_v29 = vshrl.u32 %v780_v28, 7  ;;  %v783_v30 = vand.u32 127, %v780_v28  ;;  %s1979_s10 = smov 64  }
  0x39   :  { %1717 = vmatprep.mubr.msk.f32.mxu0 %vm75_vm0, %v62_v5  ;;  %1812 = vmatprep.subr.bf16.mxu0 %v1811_v3  ;;  %v1635_v8 = vld [vmem:[%s2272_s2] ss:$0 sm:$0xff]  ;;  %s1977_s2 = smov 112   ;;  %s1980_s11 = smov 16   ;;  %vm1517_vm4 = vcmask 130048   ;;  %vm1520_vm5 = vcmask 195584  }
  0x3a   :  { %1814 = vmatpush3.bf16.msra.mxu0 %v1811_v3  ;;  %vm2154_vm3 = vcmp.le.s32.totalorder %v783_v30, %v781_v29  ;;  %s1981_s12 = smov 24   ;;  %s1982_s15 = smov [#allocation8]  }
  0x3b   :  { %1816 = vmatprep.subr.bf16.mxu0 %v1815_v6  ;;  %s1622_s16 = sshll.u32 %s1982_s15, 4  ;;  %s1623_s16 = int_to_ptr.vmem [resolvable:$true] %s1622_s16 }
  0x3c   :  { %s1940_s1 = scalar_lea.vmem %s1623_s16, 256  ;;  %p1945_p11 = scmp.lt.s32.totalorder %s1623_s16, %s1623_s16 }
  0x3d   :  { %p1941_p10 = scmp.ne.s32.totalorder %s1623_s16, %s1940_s1  ;;  %p1946_p12 = scmp.lt.s32.totalorder %s1940_s1, %s1940_s1 }
  0x3e   :  { %1818 = vmatpush3.bf16.msra.mxu0 %v1815_v6 }
  0x3f   :  { %1740 = vmatprep.subr.mxu0 %v1973_v10  ;;  %p1947_p13 = por %p1946_p12, %p1945_p11 }
  0x41   :  { %1718 = vmatmul.mubr.msk.f32.vlgmr.msra.gmra.mrb[0].mxu0 %vm75_vm0, %v63_v7  ;;  %p1948_p0 = pnand %p1947_p13, %p1941_p10 }
  0x42   :  { %1742 = vmatprep.mubr.msk.f32.mxu0 %vm1976_vm1, %v1973_v10 }
 0x114   :  { %v1719_v9 = vpop.f32.mrb[0].mxu0 }
 0x115   :  { %v148_v11 = vpop.f32.mrb[1].mxu0  ;;  %v2080_v13 = vadd.f32 %v1719_v9, %v1635_v8 }
 0x116   :  { %v2072_v12 = vadd.f32 %v1635_v8, %v148_v11 }
 0x118   :  { %167 = vrot.lane.b32.xlu1 %v2072_v12, %s1974_s7  ;;  %159 = vrot.lane.b32.xlu0 %v2072_v12, %s1975_s8 }
 0x11c   :  { %161 = vrot.lane.b32.xlu1 %v2080_v13, %s1975_s8  ;;  %163 = vrot.lane.b32.xlu0 %v2072_v12, %s1977_s2 }
 0x120   :  { %169 = vrot.lane.b32.xlu1 %v2080_v13, %s1974_s7  ;;  %165 = vrot.lane.b32.xlu0 %v2080_v13, %s1977_s2 }
 0x124   :  { %171 = vrot.lane.b32.xlu0 %v2072_v12, %s1978_s9 }
 0x18a   :  { %v2087_v14 = vpop.permute.xlu1 %167  ;;  %v2089_v15 = vpop.permute.xlu0 %159 }
 0x18b   :  { %248 = vrot.lane.b32.xlu1 %v2089_v15, %s1978_s9 }
 0x18e   :  { %v2092_v16 = vpop.permute.xlu0 %163  ;;  %v2096_v17 = vpop.permute.xlu1 %161 }
 0x18f   :  { %400 = vrot.lane.b32.xlu1 %v2087_v14, %s1978_s9  ;;  %324 = vrot.lane.b32.xlu0 %v2092_v16, %s1978_s9 }
 0x192   :  { %v2098_v18 = vpop.permute.xlu0 %165  ;;  %v2102_v19 = vpop.permute.xlu1 %169 }
 0x193   :  { %552 = vrot.lane.b32.xlu1 %v2096_v17, %s1978_s9  ;;  %476 = vrot.lane.b32.xlu0 %v2080_v13, %s1978_s9 }
 0x196   :  { %v172_v20 = vpop.permute.xlu0 %171 }
 0x197   :  { %704 = vrot.lane.b32.xlu1 %v2102_v19, %s1978_s9  ;;  %628 = vrot.lane.b32.xlu0 %v2098_v18, %s1978_s9 }
 0x198   :  { %1721 = vmatpush3.xpose.msk.msra.mxu1 %vm173_vm2, %v172_v20 }
 0x199   :  { %1725 = vmatprep.subr.mxu1 %v1973_v10 }
 0x19b   :  { %1723 = vmatmul.mubr.msk.f32.vlgmr.msra.gmra.mrb[0].mxu1 %vm173_vm2, %v2072_v12 }
 0x19c   :  { %1727 = vmatprep.mubr.msk.f32.mxu1 %vm1976_vm1, %v1973_v10 }
 0x1fd   :  { %v249_v21 = vpop.permute.xlu1 %248 }
 0x1fe   :  { %1726 = vmatpush3.xpose.msk.msra.mxu1 %vm173_vm2, %v249_v21 }
 0x1ff   :  { %1730 = vmatprep.subr.mxu1 %v1973_v10 }
 0x201   :  { %v401_v22 = vpop.permute.xlu1 %400  ;;  %1728 = vmatmul.mubr.msk.f32.vlgmr.msra.gmra.mrb[2].mxu1 %vm173_vm2, %v2089_v15  ;;  %v325_v23 = vpop.permute.xlu0 %324 }
 0x202   :  { %1731 = vmatpush3.xpose.msk.msra.mxu1 %vm173_vm2, %v325_v23  ;;  %1732 = vmatprep.mubr.msk.f32.mxu1 %vm1976_vm1, %v1973_v10 }
 0x203   :  { %1735 = vmatprep.subr.mxu1 %v1973_v10 }
 0x205   :  { %1733 = vmatmul.mubr.msk.f32.vlgmr.msra.gmra.mrb[4].mxu1 %vm173_vm2, %v2092_v16  ;;  %v477_v24 = vpop.permute.xlu0 %476  ;;  %v553_v25 = vpop.permute.xlu1 %552 }
 0x206   :  { %1736 = vmatpush3.xpose.msk.msra.mxu1 %vm173_vm2, %v401_v22  ;;  %1741 = vmatpush3.xpose.msk.msra.mxu0 %vm173_vm2, %v477_v24 }
 0x207   :  { %1737 = vmatprep.mubr.msk.f32.mxu1 %vm1976_vm1, %v1973_v10  ;;  %1745 = vmatprep.subr.mxu1 %v1973_v10 }
 0x208   :  { %1750 = vmatprep.subr.mxu0 %v1973_v10 }
 0x209   :  { %1738 = vmatmul.mubr.msk.f32.vlgmr.msra.gmra.mrb[6].mxu1 %vm173_vm2, %v2087_v14  ;;  %1743 = vmatmul.mubr.msk.f32.vlgmr.msra.gmra.mrb[2].mxu0 %vm173_vm2, %v2080_v13  ;;  %v629_v26 = vpop.permute.xlu0 %628  ;;  %v705_v27 = vpop.permute.xlu1 %704 }
 0x20a   :  { %1746 = vmatpush3.xpose.msk.msra.mxu1 %vm173_vm2, %v553_v25  ;;  %1751 = vmatpush3.xpose.msk.msra.mxu0 %vm173_vm2, %v629_v26 }
 0x20b   :  { %1747 = vmatprep.mubr.msk.f32.mxu1 %vm1976_vm1, %v1973_v10  ;;  %1752 = vmatprep.mubr.msk.f32.mxu0 %vm1976_vm1, %v1973_v10 }
 0x20c   :  { %1755 = vmatprep.subr.mxu1 %v1973_v10  ;;  %1760 = vmatprep.subr.mxu0 %v1973_v10 }
 0x20d   :  { %1748 = vmatmul.mubr.msk.f32.vlgmr.msra.gmra.mrb[8].mxu1 %vm173_vm2, %v2096_v17  ;;  %1753 = vmatmul.mubr.msk.f32.vlgmr.msra.gmra.mrb[4].mxu0 %vm173_vm2, %v2098_v18 }
 0x20e   :  { %1756 = vmatpush3.xpose.msk.msra.mxu1 %vm173_vm2, %v705_v27  ;;  %1757 = vmatprep.mubr.msk.f32.mxu1 %vm1976_vm1, %v1973_v10 }
 0x20f   :  { %1765 = vmatprep.subr.mxu1 %v1973_v10  ;;  %1762 = vmatprep.mubr.msk.f32.mxu0 %vm1976_vm1, %v1973_v10 }
 0x211   :  { %1758 = vmatmul.mubr.msk.f32.vlgmr.msra.gmra.mrb[10].mxu1 %vm173_vm2, %v2102_v19 }
 0x212   :  { %1767 = vmatprep.mubr.msk.f32.mxu1 %vm1976_vm1, %v1973_v10 }
 0x26e   :  { %v244_v32 = vpop.f32.mrb[0].mxu1 }
 0x26f   :  { %v787_v33 = vsel %vm2154_vm3, %v244_v32, -1e+30  ;;  %v1724_v34 = vpop.f32.mrb[1].mxu1 }
 0x270   :  { %v795_v35 = vsel %vm173_vm2, %v787_v33, -inf }
 0x271   :  { %796 = vmax.xlane.f32.xlu0 %v795_v35 }
 0x2d4   :  { %v320_v36 = vpop.f32.mrb[2].mxu1 }
 0x2d5   :  { %v788_v37 = vsel %vm2154_vm3, %v320_v36, -1e+30  ;;  %v1729_v38 = vpop.f32.mrb[3].mxu1 }
 0x2d6   :  { %v798_v39 = vsel %vm173_vm2, %v788_v37, -inf }
 0x2d7   :  { %799 = vmax.xlane.f32.xlu1 %v798_v39 }
 0x2d8   :  { %v396_v40 = vpop.f32.mrb[4].mxu1 }
 0x2d9   :  { %v2166_v41 = vsel %vm2154_vm3, %v396_v40, -1e+30  ;;  %v1734_v42 = vpop.f32.mrb[5].mxu1 }
 0x2da   :  { %v801_v43 = vsel %vm173_vm2, %v2166_v41, -inf }
 0x2db   :  { %802 = vmax.xlane.f32.xlu0 %v801_v43 }
 0x2dc   :  { %v472_v44 = vpop.f32.mrb[6].mxu1  ;;  %v548_v45 = vpop.f32.mrb[2].mxu0 }
 0x2dd   :  { %v790_v46 = vsel %vm2154_vm3, %v472_v44, -1e+30  ;;  %v791_v47 = vsel %vm2154_vm3, %v548_v45, -1e+30  ;;  %v1739_v48 = vpop.f32.mrb[7].mxu1  ;;  %v1744_v49 = vpop.f32.mrb[3].mxu0 }
 0x2de   :  { %v804_v50 = vsel %vm173_vm2, %v790_v46, -inf  ;;  %v807_v51 = vsel %vm173_vm2, %v791_v47, -inf }
 0x2df   :  { %805 = vmax.xlane.f32.xlu0 %v804_v50  ;;  %808 = vmax.xlane.f32.xlu1 %v807_v51 }
 0x2e0   :  { %v624_v52 = vpop.f32.mrb[8].mxu1  ;;  %v700_v53 = vpop.f32.mrb[4].mxu0 }
 0x2e1   :  { %v792_v54 = vsel %vm2154_vm3, %v624_v52, -1e+30  ;;  %v793_v55 = vsel %vm2154_vm3, %v700_v53, -1e+30  ;;  %v1749_v56 = vpop.f32.mrb[9].mxu1  ;;  %v1754_v57 = vpop.f32.mrb[5].mxu0 }
 0x2e2   :  { %v810_v58 = vsel %vm173_vm2, %v792_v54, -inf  ;;  %v813_v59 = vsel %vm173_vm2, %v793_v55, -inf }
 0x2e3   :  { %811 = vmax.xlane.f32.xlu0 %v810_v58  ;;  %814 = vmax.xlane.f32.xlu1 %v813_v59 }
 0x2e4   :  { %v776_v60 = vpop.f32.mrb[10].mxu1 }
 0x2e5   :  { %v794_v61 = vsel %vm2154_vm3, %v776_v60, -1e+30  ;;  %v1759_v62 = vpop.f32.mrb[11].mxu1 }
 0x2e6   :  { %v816_v63 = vsel %vm173_vm2, %v794_v61, -inf }
 0x2e7   :  { %817 = vmax.xlane.f32.xlu0 %v816_v63 }
 0x2f4   :  { %883 = vrot.lane.b32.xlu1 %v2072_v12, %s1979_s10 }
 0x2f8   :  { %1035 = vrot.lane.b32.xlu1 %v2092_v16, %s1979_s10 }
 0x2fc   :  { %1111 = vrot.lane.b32.xlu1 %v2087_v14, %s1979_s10 }
 0x2fd   :  { %959 = vrot.lane.b32.xlu0 %v2089_v15, %s1979_s10 }
 0x2fe   :  { %v797_v0 = vpop.xlane.xlu0 %796 }
 0x2ff   :  { %v819_v5 = vsub.f32 %v787_v33, %v797_v0 }
 0x300   :  { %1263 = vrot.lane.b32.xlu1 %v2096_v17, %s1979_s10 }
 0x301   :  { %1187 = vrot.lane.b32.xlu0 %v2080_v13, %s1979_s10  ;;  %v827_v11 = vmul.f32 1.442695, %v819_v5 }
 0x364   :  { %v800_v1 = vpop.xlane.xlu1 %799 }
 0x365   :  { %v820_v2 = vsub.f32 %v788_v37, %v800_v1 }
 0x367   :  { %v829_v3 = vmul.f32 1.442695, %v820_v2 }
 0x368   :  { %v803_v4 = vpop.xlane.xlu0 %802 }
 0x369   :  { %1842 = vpow2.f32 %v829_v3  ;;  %v821_v21 = vsub.f32 %v2166_v41, %v803_v4 }
 0x36b   :  { %v831_v28 = vmul.f32 1.442695, %v821_v21 }
 0x36c   :  { %v809_v6 = vpop.xlane.xlu1 %808  ;;  %v806_v7 = vpop.xlane.xlu0 %805 }
 0x36d   :  { %v823_v8 = vsub.f32 %v791_v47, %v809_v6  ;;  %v822_v9 = vsub.f32 %v790_v46, %v806_v7 }
 0x36f   :  { %v835_v12 = vmul.f32 1.442695, %v823_v8  ;;  %v833_v14 = vmul.f32 1.442695, %v822_v9 }
 0x370   :  { %v815_v15 = vpop.xlane.xlu1 %814  ;;  %v812_v16 = vpop.xlane.xlu0 %811 }
 0x371   :  { %1844 = vpow2.f32 %v835_v12  ;;  %v825_v17 = vsub.f32 %v793_v55, %v815_v15  ;;  %v824_v20 = vsub.f32 %v792_v54, %v812_v16  ;;  %v1523_v16 = vld [vmem:[#allocation7] sm:$0xff] }
 0x372   :  { %1846 = vpow2.f32 %v833_v14 }
 0x373   :  { %v1843_v13 = vpop.eup %1842  ;;  %1848 = vpow2.f32 %v827_v11  ;;  %v839_v22 = vmul.f32 1.442695, %v825_v17  ;;  %v837_v23 = vmul.f32 1.442695, %v824_v20  ;;  %v1524_v17 = vld [vmem:[#allocation7 + $0x8] sm:$0xff] }
 0x374   :  { %v884_v24 = vpop.permute.xlu1 %883  ;;  %v818_v25 = vpop.xlane.xlu0 %817  ;;  %v846_v26 = vsel %vm173_vm2, %v1843_v13, 0.0  ;;  %v1819_v21 = vpack.c.bf16 %v1524_v17, %v1523_v16 }
 0x375   :  { %v826_v27 = vsub.f32 %v794_v61, %v818_v25  ;;  %847 = vadd.xlane.f32.xlu0 %v846_v26  ;;  %1761 = vmatpush3.msra.mxu0 %v884_v24  ;;  %1850 = vpow2.f32 %v837_v23  ;;  %v1526_v23 = vld [vmem:[#allocation7 + $0x18] sm:$0xff] }
 0x376   :  { %1770 = vmatprep.subr.mxu0 %v1973_v10  ;;  %1852 = vpow2.f32 %v839_v22 }
 0x377   :  { %v841_v29 = vmul.f32 1.442695, %v826_v27 }
 0x378   :  { %v960_v30 = vpop.permute.xlu0 %959  ;;  %v1036_v45 = vpop.permute.xlu1 %1035 }
 0x379   :  { %1854 = vpow2.f32 %v841_v29  ;;  %1766 = vmatpush3.msra.mxu1 %v960_v30 }
 0x37a   :  { %1775 = vmatprep.subr.mxu1 %v1973_v10  ;;  %1856 = vpow2.f32 %v831_v28 }
 0x37b   :  { %v2201_v31 = vpop.eup %1844 }
 0x37c   :  { %v1847_v32 = vpop.eup %1846  ;;  %v855_v33 = vsel %vm173_vm2, %v2201_v31, 0.0  ;;  %v1188_v46 = vpop.permute.xlu0 %1187 }
 0x37d   :  { %v1849_v34 = vpop.eup %1848  ;;  %856 = vadd.xlane.f32.xlu1 %v855_v33  ;;  %v852_v35 = vsel %vm173_vm2, %v1847_v32, 0.0  ;;  %v1112_v47 = vpop.permute.xlu1 %1111 }
 0x37e   :  { %853 = vadd.xlane.f32.xlu0 %v852_v35  ;;  %v843_v37 = vsel %vm173_vm2, %v1849_v34, 0.0 }
 0x37f   :  { %v1851_v36 = vpop.eup %1850 }
 0x380   :  { %v2207_v38 = vpop.eup %1852  ;;  %v858_v39 = vsel %vm173_vm2, %v1851_v36, 0.0 }
 0x381   :  { %844 = vadd.xlane.f32.xlu1 %v843_v37  ;;  %v861_v41 = vsel %vm173_vm2, %v2207_v38, 0.0  ;;  %v1264_v49 = vpop.permute.xlu1 %1263 }
 0x382   :  { %859 = vadd.xlane.f32.xlu0 %v858_v39 }
 0x383   :  { %v1855_v40 = vpop.eup %1854 }
 0x384   :  { %v864_v42 = vsel %vm173_vm2, %v1855_v40, 0.0  ;;  %v1857_v43 = vpop.eup %1856 }
 0x385   :  { %862 = vadd.xlane.f32.xlu1 %v861_v41  ;;  %v849_v44 = vsel %vm173_vm2, %v1857_v43, 0.0 }
 0x386   :  { %865 = vadd.xlane.f32.xlu0 %v864_v42 }
 0x389   :  { %850 = vadd.xlane.f32.xlu1 %v849_v44 }
 0x39a   :  { %1415 = vrot.lane.b32.xlu1 %v2102_v19, %s1979_s10 }
 0x39c   :  { %1339 = vrot.lane.b32.xlu0 %v2098_v18, %s1979_s10 }
 0x402   :  { %v848_v48 = vpop.xlane.xlu0 %847 }
 0x403   :  { %1858 = vrcp.f32 %v848_v48 }
 0x40a   :  { %v857_v50 = vpop.xlane.xlu1 %856 }
 0x40b   :  { %v854_v51 = vpop.xlane.xlu0 %853 }
 0x40c   :  { %1860 = vrcp.f32 %v854_v51 }
 0x40d   :  { %v1859_v52 = vpop.eup %1858 }
 0x40e   :  { %v876_v53 = vmul.f32 %v1859_v52, %v1843_v13  ;;  %v845_v54 = vpop.xlane.xlu1 %844 }
 0x40f   :  { %1862 = vrcp.f32 %v845_v54  ;;  %v860_v55 = vpop.xlane.xlu0 %859 }
 0x410   :  { %1864 = vrcp.f32 %v860_v55  ;;  %1768 = vmatmul.mubr.msk.f32.vlgmr.msra.gmra.mrb[12].mxu1 %vm173_vm2, %v876_v53 }
 0x411   :  { %1776 = vmatpush3.msra.mxu1 %v1112_v47  ;;  %1777 = vmatprep.mubr.msk.f32.mxu1 %vm1976_vm1, %v1973_v10 }
 0x412   :  { %v863_v18 = vpop.xlane.xlu1 %862  ;;  %1785 = vmatprep.subr.mxu1 %v1973_v10 }
 0x413   :  { %v866_v19 = vpop.xlane.xlu0 %865 }
 0x414   :  { %1866 = vrcp.f32 %v866_v19 }
 0x416   :  { %v1861_v56 = vpop.eup %1860  ;;  %v851_v57 = vpop.xlane.xlu1 %850 }
 0x417   :  { %v878_v58 = vmul.f32 %v1861_v56, %v1847_v32  ;;  %1868 = vrcp.f32 %v851_v57  ;;  %v1340_v7 = vpop.permute.xlu0 %1339 }
 0x418   :  { %1870 = vrcp.f32 %v857_v50 }
 0x419   :  { %v1863_v59 = vpop.eup %1862  ;;  %1778 = vmatmul.mubr.msk.f32.vlgmr.msra.gmra.mrb[14].mxu1 %vm173_vm2, %v878_v58  ;;  %1872 = vrcp.f32 %v863_v18 }
 0x41a   :  { %v1865_v60 = vpop.eup %1864  ;;  %v875_v61 = vmul.f32 %v1863_v59, %v1849_v34  ;;  %1786 = vmatpush3.msra.mxu1 %v1264_v49  ;;  %1787 = vmatprep.mubr.msk.f32.mxu1 %vm1976_vm1, %v1973_v10  ;;  %v1416_v63 = vpop.permute.xlu1 %1415 }
 0x41b   :  { %v880_v62 = vmul.f32 %v1865_v60, %v1851_v36  ;;  %1795 = vmatprep.subr.mxu1 %v1973_v10 }
 0x41c   :  { %1763 = vmatmul.mubr.msk.f32.vlgmr.msra.gmra.mrb[6].mxu0 %vm173_vm2, %v875_v61 }
 0x41d   :  { %1771 = vmatpush3.msra.mxu0 %v1036_v45  ;;  %1788 = vmatmul.mubr.msk.f32.vlgmr.msra.gmra.mrb[16].mxu1 %vm173_vm2, %v880_v62  ;;  %v1662_v45 = vld [vmem:[%s2274_s4] ss:$0 sm:$0xff] }
 0x41e   :  { %v1867_v0 = vpop.eup %1866  ;;  %1796 = vmatpush3.msra.mxu1 %v1416_v63  ;;  %1797 = vmatprep.mubr.msk.f32.mxu1 %vm1976_vm1, %v1973_v10 }
 0x41f   :  { %v882_v1 = vmul.f32 %v1867_v0, %v1855_v40  ;;  %1772 = vmatprep.mubr.msk.f32.mxu0 %vm1976_vm1, %v1973_v10  ;;  %1780 = vmatprep.subr.mxu0 %v1973_v10 }
 0x421   :  { %v1869_v2 = vpop.eup %1868  ;;  %1798 = vmatmul.mubr.msk.f32.vlgmr.msra.gmra.mrb[18].mxu1 %vm173_vm2, %v882_v1 }
 0x422   :  { %v877_v3 = vmul.f32 %v1869_v2, %v1857_v43  ;;  %v1871_v4 = vpop.eup %1870 }
 0x423   :  { %v879_v5 = vmul.f32 %v1871_v4, %v2201_v31  ;;  %v1873_v6 = vpop.eup %1872 }
 0x424   :  { %1773 = vmatmul.mubr.msk.f32.vlgmr.msra.gmra.mrb[8].mxu0 %vm173_vm2, %v877_v3  ;;  %v881_v8 = vmul.f32 %v1873_v6, %v2207_v38 }
 0x425   :  { %1781 = vmatpush3.msra.mxu0 %v1188_v46  ;;  %1782 = vmatprep.mubr.msk.f32.mxu0 %vm1976_vm1, %v1973_v10 }
 0x426   :  { %1790 = vmatprep.subr.mxu0 %v1973_v10 }
 0x428   :  { %1783 = vmatmul.mubr.msk.f32.vlgmr.msra.gmra.mrb[10].mxu0 %vm173_vm2, %v879_v5 }
 0x429   :  { %1791 = vmatpush3.msra.mxu0 %v1340_v7  ;;  %1792 = vmatprep.mubr.msk.f32.mxu0 %vm1976_vm1, %v1973_v10  ;;  %v1525_v10 = vld [vmem:[#allocation7 + $0x10] sm:$0xff] }
 0x42a   :  { %1820 = vmatprep.subr.bf16.mxu0 %v1819_v21  ;;  %v1823_v25 = vpack.c.bf16 %v1526_v23, %v1525_v10 }
 0x42c   :  { %1793 = vmatmul.mubr.msk.f32.vlgmr.msra.gmra.mrb[12].mxu0 %vm173_vm2, %v881_v8 }
 0x42d   :  { %1822 = vmatpush3.bf16.msra.mxu0 %v1819_v21 }
 0x42e   :  { %1824 = vmatprep.subr.bf16.mxu0 %v1823_v25 }
 0x431   :  { %1826 = vmatpush3.bf16.msra.mxu0 %v1823_v25 }
 0x4e3   :  { %v1031_v9 = vpop.f32.mrb[12].mxu1 }
 0x4e4   :  { %1493 = vrot.lane.b32.xlu0 %v1031_v9, %s1971_s6  ;;  %v1769_v11 = vpop.f32.mrb[13].mxu1 }
 0x4ec   :  { %v1183_v12 = vpop.f32.mrb[14].mxu1 }
 0x4ed   :  { %v1779_v14 = vpop.f32.mrb[15].mxu1 }
 0x4ef   :  { %v955_v15 = vpop.f32.mrb[6].mxu0 }
 0x4f0   :  { %v1335_v20 = vpop.f32.mrb[16].mxu1  ;;  %v1764_v13 = vpop.f32.mrb[7].mxu0 }
 0x4f1   :  { %1495 = vrot.lane.b32.xlu1 %v1335_v20, %s1971_s6  ;;  %v1789_v22 = vpop.f32.mrb[17].mxu1 }
 0x4f4   :  { %v1487_v24 = vpop.f32.mrb[18].mxu1 }
 0x4f5   :  { %v1799_v26 = vpop.f32.mrb[19].mxu1 }
 0x4f7   :  { %v1107_v27 = vpop.f32.mrb[8].mxu0 }
 0x4f8   :  { %v1774_v28 = vpop.f32.mrb[9].mxu0  ;;  %1501 = vrot.lane.b32.xlu0 %v1107_v27, %s1980_s11 }
 0x4fb   :  { %v1259_v29 = vpop.f32.mrb[10].mxu0 }
 0x4fc   :  { %v1784_v30 = vpop.f32.mrb[11].mxu0  ;;  %1509 = vrot.lane.b32.xlu0 %v1183_v12, %s1981_s12 }
 0x4ff   :  { %v1411_v31 = vpop.f32.mrb[12].mxu0 }
 0x500   :  { %1503 = vrot.lane.b32.xlu1 %v1411_v31, %s1980_s11  ;;  %v1794_v32 = vpop.f32.mrb[13].mxu0 }
 0x504   :  { %1511 = vrot.lane.b32.xlu1 %v1487_v24, %s1981_s12 }
 0x556   :  { %v1494_v33 = vpop.permute.xlu0 %1493 }
 0x557   :  { %v1515_v35 = vsel %vm173_vm2, %v955_v15, %v1494_v33 }
 0x563   :  { %v1496_v36 = vpop.permute.xlu1 %1495 }
 0x564   :  { %v1516_v41 = vsel %vm173_vm2, %v1259_v29, %v1496_v36 }
 0x56a   :  { %v1502_v34 = vpop.permute.xlu0 %1501 }
 0x56b   :  { %v1518_v37 = vsel %vm1517_vm4, %v1515_v35, %v1502_v34 }
 0x56e   :  { %v1510_v38 = vpop.permute.xlu0 %1509 }
 0x56f   :  { %v1521_v39 = vsel %vm1520_vm5, %v1518_v37, %v1510_v38 }
 0x570   :  { %1808 = vmatprep.mubr.msk.f32.mxu0 %vm75_vm0, %v1521_v39 }
 0x572   :  { %v1504_v40 = vpop.permute.xlu1 %1503 }
 0x573   :  { %v1519_v42 = vsel %vm1517_vm4, %v1516_v41, %v1504_v40 }
 0x576   :  { %v1512_v43 = vpop.permute.xlu1 %1511 }
 0x577   :  { %v1522_v44 = vsel %vm1520_vm5, %v1519_v42, %v1512_v43 }
 0x578   :  { %1809 = vmatmul.mubr.msk.f32.vlgmr.msra.gmra.mrb[14].mxu0 %vm75_vm0, %v1522_v44 }
 0x64b   :  { %v1810_v46 = vpop.f32.mrb[14].mxu0 }
 0x64c   :  { %v1612_v47 = vadd.f32 %v1810_v46, %v1662_v45  ;;  %v1606_v48 = vpop.f32.mrb[15].mxu0 }
 0x64d   :  { %v1607_v49 = vadd.f32 %v1662_v45, %v1606_v48 }
 0x64e   :  { %1616 = vst.msk [vmem:[#allocation8 + $0x8] sm:$0xff] %vm75_vm0, %v1612_v47 }
 0x64f   :  { %1615 = vst.msk [vmem:[#allocation8] sm:$0xff] %vm75_vm0, %v1607_v49 }
 0x650   :  { %1951 = shalt.err (!%p1948_p0)
}
 0x651   :  { %s1952_s18 = scalar_lea.hbm %s2275_s5, 256 }
 0x652   :  { %p1953_p1 = scmp.ne.s32.totalorder %s2275_s5, %s1952_s18  ;;  %p1956_p2 = scmp.lt.u32.totalorder %s1952_s18, %s2275_s5 }
 0x654   :  { %p1958_p3 = pnand %p1956_p2, %p1953_p1 }
 0x656   :  { %1961 = shalt.err (!%p1958_p3)
}
 0x657   :  { %1628 = dma.vmem_to_hbm [thread:$0]  %s1623_s16, 256, %s2275_s5, [#allocation4], %s1970_s30, %s1970_s30, %s1971_s6  }
 0x658   :  { %1966 = dma.done.wait [#allocation4], 256  }
 0x659   :  { %1967 = vsyncadd [#allocation4], 4294967040 }
 0x65a   :  { %1632 = vsyncpa [#allocation3], 1 }
 0x65b   :  { %1633 = vsyncpa [#allocation6], 1 }
 0x65c   :  { %1634 = vsyncpa [#allocation4], 1 }

</bundles_post_ra>
